<compile_context>
chip_gen: v7x
topology: tpu7x:2x2x1
jax: 0.10.0
libtpu: 0.0.40
codegen_flags: <defaults>
</compile_context>

<pallas_src>
import jax
import jax.numpy as jnp
from jax.experimental import pallas as pl
from jax.experimental.pallas import tpu as pltpu


def invariance_kernel(x_ref, w1_ref, b1_ref, w2_ref, b2_ref, o_ref,
                      acc_ref, cnt_ref):
    k = pl.program_id(1)                           # reduction step over N tiles

    @pl.when(k == 0)
    def _init():
        acc_ref[...] = jnp.zeros_like(acc_ref)
        cnt_ref[...] = jnp.zeros_like(cnt_ref)

    x = x_ref[...]                                 # [TN, Din] (batch dim squeezed)
    tn, din = x.shape
    mask = (x[:, 0:1] != 0).astype(jnp.float32)    # [TN, 1]

    # feature extractor, layer 1 (f32 accumulate)
    if din <= 8:
        # tiny contraction dim: Din VPU fused multiply-adds beat a 4/128 MXU pass
        xf = x.astype(jnp.float32)
        w1 = w1_ref[...].astype(jnp.float32)
        h = b1_ref[...]                            # [1, H] broadcasts over TN
        for d in range(din):                       # static, small
            h = h + xf[:, d:d + 1] * w1[d:d + 1, :]
    else:
        h = jnp.dot(x, w1_ref[...],
                    preferred_element_type=jnp.float32) + b1_ref[...]
    h = jnp.maximum(h, 0.0)                        # ReLU, f32  [TN, H]

    # masked-sum pooling of h (W2 is applied AFTER pooling — linearity)
    acc_ref[...] += jnp.sum(h * mask, axis=0, keepdims=True)   # [1, H]
    cnt_ref[...] += jnp.sum(mask, axis=0, keepdims=True)       # [1, 1]

    @pl.when(k == pl.num_programs(1) - 1)
    def _finalize():
        counts = cnt_ref[...]                                        # [1, 1]
        inv = pl.reciprocal(jnp.maximum(counts, 1.0), approx=True)   # EUP
        pooled = acc_ref[...] * inv                                  # [1, H]
        nonempty = jnp.minimum(counts, 1.0)     # 0 for empty set -> output 0
        out = jnp.dot(pooled.astype(w2_ref.dtype), w2_ref[...],
                      preferred_element_type=jnp.float32)            # [1, Dp]
        o_ref[...] = (out + b2_ref[...] * nonempty).astype(o_ref.dtype)


def invariance_model(x, w1, b1, w2, b2, *, compute_dtype=None, block_n=None):
    """x: [B, N, Din]; returns [B, Dout] (f32)."""
    B, N, Din = x.shape
    H = w1.shape[1]
    Dout = w2.shape[1]

    LANES = 128
    Dp = ((Dout + LANES - 1) // LANES) * LANES     # lane-dense output width

    # optional bf16 MXU path (v6e/v7x); accumulation stays f32 in-kernel
    if compute_dtype is not None:
        x = x.astype(compute_dtype)
        w1 = w1.astype(compute_dtype)
        w2 = w2.astype(compute_dtype)

    b1 = b1.astype(jnp.float32).reshape(1, H)
    b2 = b2.astype(jnp.float32)
    if Dp != Dout:                                 # zero-pad -> unmasked stores
        w2 = jnp.pad(w2, ((0, 0), (0, Dp - Dout)))
        b2 = jnp.pad(b2, ((0, Dp - Dout),))
    b2 = b2.reshape(1, Dp)

    # N tile: whole set if small, otherwise a 128-row tile (sublane/pack safe
    # for f32 and bf16).  Re-derive downward on v7x (64 MiB VMEM) if needed.
    if block_n is None:
        block_n = N if N <= 512 else 512
    assert N % block_n == 0, "N must be divisible by block_n"
    grid = (B, N // block_n)

    out = pl.pallas_call(
        invariance_kernel,
        out_shape=jax.ShapeDtypeStruct((B, 1, Dp), jnp.float32),
        grid_spec=pltpu.PrefetchScalarGridSpec(
            num_scalar_prefetch=0,
            grid=grid,
            in_specs=[
                pl.BlockSpec((None, block_n, Din), lambda b, k: (b, k, 0)),
                pl.BlockSpec((Din, H), lambda b, k: (0, 0)),
                pl.BlockSpec((1, H), lambda b, k: (0, 0)),
                pl.BlockSpec((H, Dp), lambda b, k: (0, 0)),
                pl.BlockSpec((1, Dp), lambda b, k: (0, 0)),
            ],
            out_specs=pl.BlockSpec((None, 1, Dp), lambda b, k: (b, 0, 0)),
            scratch_shapes=[
                pltpu.VMEM((1, H), jnp.float32),   # masked sum of h
                pltpu.VMEM((1, 1), jnp.float32),   # valid-element count
            ],
        ),
        compiler_params=pltpu.CompilerParams(
            dimension_semantics=("parallel", "arbitrary"),
            vmem_limit_bytes=32 * 1024 * 1024,
        ),
    )(x, w1, b1, w2, b2)

    return out[:, 0, :Dout]                        # drop lane padding


def reference(x, w1, b1, w2, b2):
    mask = (x[:, :, 0] != 0).astype(jnp.float32)
    h = jnp.maximum(jnp.einsum('bnd,dh->bnh', x, w1) + b1, 0.0)
    y = jnp.einsum('bnh,ho->bno', h, w2) + b2
    s = jnp.sum(y * mask[:, :, None], axis=1)
    c = jnp.maximum(jnp.sum(mask, axis=1, keepdims=True), 1.0)
    return s / c


if __name__ == "__main__":
    key = jax.random.PRNGKey(0)
    B, N, D_in, H, D_out = 4, 8, 4, 32, 32

    kx, k1, k2, k3, k4 = jax.random.split(key, 5)
    x = jax.random.normal(kx, (B, N, D_in), dtype=jnp.float32)
    # non-trivial mask; batch 3 is a fully-empty set (exercises the count guard)
    x = x.at[0, 3, 0].set(0.0)
    x = x.at[1, 0, 0].set(0.0)
    x = x.at[1, 5, 0].set(0.0)
    x = x.at[3, :, 0].set(0.0)

    w1 = jax.random.normal(k1, (D_in, H), jnp.float32) * 0.1
    b1 = jax.random.normal(k2, (H,), jnp.float32) * 0.1
    w2 = jax.random.normal(k3, (H, D_out), jnp.float32) * 0.1
    b2 = jax.random.normal(k4, (D_out,), jnp.float32) * 0.1

    ref = reference(x, w1, b1, w2, b2)

    # f32 path
    out = jax.block_until_ready(invariance_model(x, w1, b1, w2, b2))
    assert out.shape == (B, D_out)
    assert jnp.allclose(out, ref, atol=2e-3, rtol=2e-3), \
        f"f32 mismatch: {jnp.max(jnp.abs(out - ref))}"
    # empty set must produce zeros (matches masked-mean with clamped count)
    assert jnp.allclose(out[3], 0.0, atol=1e-6)

    # bf16-input / f32-accumulate path (v6e / v7x recommendation)
    out_bf16 = jax.block_until_ready(
        invariance_model(x, w1, b1, w2, b2, compute_dtype=jnp.bfloat16))
    assert out_bf16.shape == (B, D_out)
    assert jnp.allclose(out_bf16, ref, atol=5e-2, rtol=5e-2), \
        f"bf16 mismatch: {jnp.max(jnp.abs(out_bf16 - ref))}"

    print("KERNEL_OK")
</pallas_src>

<mosaic_0001>
module attributes {stable_mosaic.version = 11 : i64} {
  func.func @invariance_kernel(%arg0: i32, %arg1: i32, %arg2: memref<1x8x4xf32, #tpu.memory_space<vmem>>, %arg3: memref<4x32xf32, #tpu.memory_space<vmem>>, %arg4: memref<1x32xf32, #tpu.memory_space<vmem>>, %arg5: memref<32x128xf32, #tpu.memory_space<vmem>>, %arg6: memref<1x128xf32, #tpu.memory_space<vmem>>, %arg7: memref<1x1x128xf32, #tpu.memory_space<vmem>>, %arg8: memref<1x32xf32, #tpu.memory_space<vmem>>, %arg9: memref<1x1xf32, #tpu.memory_space<vmem>>) attributes {dimension_semantics = [#tpu.dimension_semantics<parallel>, #tpu.dimension_semantics<arbitrary>], iteration_bounds = array<i64: 4, 1>, scalar_prefetch = 0 : i64, scratch_operands = 2 : i64, tpu.core_type = #tpu.core_type<tc>, window_params = [{transform_indices = @transform_0, window_bounds = array<i64: 1, 8, 4>}, {pipeline_mode = #tpu.pipeline_mode<synchronous>, transform_indices = @transform_1, window_bounds = array<i64: 4, 32>}, {pipeline_mode = #tpu.pipeline_mode<synchronous>, transform_indices = @transform_2, window_bounds = array<i64: 1, 32>}, {pipeline_mode = #tpu.pipeline_mode<synchronous>, transform_indices = @transform_3, window_bounds = array<i64: 32, 128>}, {pipeline_mode = #tpu.pipeline_mode<synchronous>, transform_indices = @transform_4, window_bounds = array<i64: 1, 128>}, {transform_indices = @transform_5, window_bounds = array<i64: 1, 1, 128>}]} {
    %c0_i32 = arith.constant 0 : i32
    %0 = arith.cmpi eq, %arg1, %c0_i32 : i32
    %1 = arith.extui %0 : i1 to i32
    %c0_i32_0 = arith.constant 0 : i32
    %2 = arith.cmpi ne, %1, %c0_i32_0 : i32
    scf.if %2 {
      %cst_20 = arith.constant 0.000000e+00 : f32
      %54 = vector.broadcast %cst_20 : f32 to vector<1x32xf32>
      %c0_21 = arith.constant 0 : index
      %c0_22 = arith.constant 0 : index
      %55 = vector.load %arg8[%c0_21, %c0_22] : memref<1x32xf32, #tpu.memory_space<vmem>>, vector<1x32xf32>
      tpu.vector_store %arg8[%c0_21, %c0_22], %54 {strides = array<i32>} : memref<1x32xf32, #tpu.memory_space<vmem>>, vector<1x32xf32>,
      %cst_23 = arith.constant 0.000000e+00 : f32
      %56 = vector.broadcast %cst_23 : f32 to vector<1x1xf32>
      %c0_24 = arith.constant 0 : index
      %c0_25 = arith.constant 0 : index
      %57 = vector.load %arg9[%c0_24, %c0_25] : memref<1x1xf32, #tpu.memory_space<vmem>>, vector<1x1xf32>
      tpu.vector_store %arg9[%c0_24, %c0_25], %56 {strides = array<i32>} : memref<1x1xf32, #tpu.memory_space<vmem>>, vector<1x1xf32>,
    } else {
    }
    %c0 = arith.constant 0 : index
    %c0_1 = arith.constant 0 : index
    %c0_2 = arith.constant 0 : index
    %3 = vector.load %arg2[%c0, %c0_1, %c0_2] : memref<1x8x4xf32, #tpu.memory_space<vmem>>, vector<1x8x4xf32>
    %4 = vector.shape_cast %3 : vector<1x8x4xf32> to vector<8x4xf32>
    %5 = vector.extract_strided_slice %4 {offsets = [0, 0], sizes = [8, 1], strides = [1, 1]} : vector<8x4xf32> to vector<8x1xf32>
    %cst = arith.constant 0.000000e+00 : f32
    %6 = vector.broadcast %cst : f32 to vector<8x1xf32>
    %7 = arith.cmpf one, %5, %6 : vector<8x1xf32>
    %8 = arith.extui %7 : vector<8x1xi1> to vector<8x1xi32>
    %9 = arith.sitofp %8 : vector<8x1xi32> to vector<8x1xf32>
    %c0_3 = arith.constant 0 : index
    %c0_4 = arith.constant 0 : index
    %10 = vector.load %arg3[%c0_3, %c0_4] : memref<4x32xf32, #tpu.memory_space<vmem>>, vector<4x32xf32>
    %c0_5 = arith.constant 0 : index
    %c0_6 = arith.constant 0 : index
    %11 = vector.load %arg4[%c0_5, %c0_6] : memref<1x32xf32, #tpu.memory_space<vmem>>, vector<1x32xf32>
    %12 = vector.extract_strided_slice %4 {offsets = [0, 0], sizes = [8, 1], strides = [1, 1]} : vector<8x4xf32> to vector<8x1xf32>
    %13 = vector.extract_strided_slice %10 {offsets = [0, 0], sizes = [1, 32], strides = [1, 1]} : vector<4x32xf32> to vector<1x32xf32>
    %14 = vector.broadcast %12 : vector<8x1xf32> to vector<8x32xf32>
    %15 = vector.broadcast %13 : vector<1x32xf32> to vector<8x32xf32>
    %16 = arith.mulf %14, %15 : vector<8x32xf32>
    %17 = vector.broadcast %11 : vector<1x32xf32> to vector<8x32xf32>
    %18 = arith.addf %17, %16 : vector<8x32xf32>
    %19 = vector.extract_strided_slice %4 {offsets = [0, 1], sizes = [8, 1], strides = [1, 1]} : vector<8x4xf32> to vector<8x1xf32>
    %20 = vector.extract_strided_slice %10 {offsets = [1, 0], sizes = [1, 32], strides = [1, 1]} : vector<4x32xf32> to vector<1x32xf32>
    %21 = vector.broadcast %19 : vector<8x1xf32> to vector<8x32xf32>
    %22 = vector.broadcast %20 : vector<1x32xf32> to vector<8x32xf32>
    %23 = arith.mulf %21, %22 : vector<8x32xf32>
    %24 = arith.addf %18, %23 : vector<8x32xf32>
    %25 = vector.extract_strided_slice %4 {offsets = [0, 2], sizes = [8, 1], strides = [1, 1]} : vector<8x4xf32> to vector<8x1xf32>
    %26 = vector.extract_strided_slice %10 {offsets = [2, 0], sizes = [1, 32], strides = [1, 1]} : vector<4x32xf32> to vector<1x32xf32>
    %27 = vector.broadcast %25 : vector<8x1xf32> to vector<8x32xf32>
    %28 = vector.broadcast %26 : vector<1x32xf32> to vector<8x32xf32>
    %29 = arith.mulf %27, %28 : vector<8x32xf32>
    %30 = arith.addf %24, %29 : vector<8x32xf32>
    %31 = vector.extract_strided_slice %4 {offsets = [0, 3], sizes = [8, 1], strides = [1, 1]} : vector<8x4xf32> to vector<8x1xf32>
    %32 = vector.extract_strided_slice %10 {offsets = [3, 0], sizes = [1, 32], strides = [1, 1]} : vector<4x32xf32> to vector<1x32xf32>
    %33 = vector.broadcast %31 : vector<8x1xf32> to vector<8x32xf32>
    %34 = vector.broadcast %32 : vector<1x32xf32> to vector<8x32xf32>
    %35 = arith.mulf %33, %34 : vector<8x32xf32>
    %36 = arith.addf %30, %35 : vector<8x32xf32>
    %cst_7 = arith.constant 0.000000e+00 : f32
    %37 = vector.broadcast %cst_7 : f32 to vector<8x32xf32>
    %38 = arith.maximumf %36, %37 : vector<8x32xf32>
    %c0_8 = arith.constant 0 : index
    %c0_9 = arith.constant 0 : index
    %39 = vector.load %arg8[%c0_8, %c0_9] : memref<1x32xf32, #tpu.memory_space<vmem>>, vector<1x32xf32>
    %40 = vector.broadcast %9 : vector<8x1xf32> to vector<8x32xf32>
    %41 = arith.mulf %38, %40 : vector<8x32xf32>
    %cst_10 = arith.constant dense<0.000000e+00> : vector<32xf32>
    %42 = vector.multi_reduction <add>, %41, %cst_10 [0] : vector<8x32xf32> to vector<32xf32>
    %43 = vector.shape_cast %42 : vector<32xf32> to vector<1x32xf32>
    %44 = arith.addf %39, %43 : vector<1x32xf32>
    %c0_11 = arith.constant 0 : index
    %c0_12 = arith.constant 0 : index
    %45 = vector.load %arg8[%c0_11, %c0_12] : memref<1x32xf32, #tpu.memory_space<vmem>>, vector<1x32xf32>
    tpu.vector_store %arg8[%c0_11, %c0_12], %44 {strides = array<i32>} : memref<1x32xf32, #tpu.memory_space<vmem>>, vector<1x32xf32>,
    %c0_13 = arith.constant 0 : index
    %c0_14 = arith.constant 0 : index
    %46 = vector.load %arg9[%c0_13, %c0_14] : memref<1x1xf32, #tpu.memory_space<vmem>>, vector<1x1xf32>
    %cst_15 = arith.constant dense<0.000000e+00> : vector<1xf32>
    %47 = vector.multi_reduction <add>, %9, %cst_15 [0] : vector<8x1xf32> to vector<1xf32>
    %48 = vector.shape_cast %47 : vector<1xf32> to vector<1x1xf32>
    %49 = arith.addf %46, %48 : vector<1x1xf32>
    %c0_16 = arith.constant 0 : index
    %c0_17 = arith.constant 0 : index
    %50 = vector.load %arg9[%c0_16, %c0_17] : memref<1x1xf32, #tpu.memory_space<vmem>>, vector<1x1xf32>
    tpu.vector_store %arg9[%c0_16, %c0_17], %49 {strides = array<i32>} : memref<1x1xf32, #tpu.memory_space<vmem>>, vector<1x1xf32>,
    %c0_i32_18 = arith.constant 0 : i32
    %51 = arith.cmpi eq, %arg1, %c0_i32_18 : i32
    %52 = arith.extui %51 : i1 to i32
    %c0_i32_19 = arith.constant 0 : i32
    %53 = arith.cmpi ne, %52, %c0_i32_19 : i32
    scf.if %53 {
      %c0_20 = arith.constant 0 : index
      %c0_21 = arith.constant 0 : index
      %54 = vector.load %arg9[%c0_20, %c0_21] : memref<1x1xf32, #tpu.memory_space<vmem>>, vector<1x1xf32>
      %cst_22 = arith.constant 1.000000e+00 : f32
      %55 = vector.broadcast %cst_22 : f32 to vector<1x1xf32>
      %56 = arith.maximumf %54, %55 : vector<1x1xf32>
      %57 = tpu.reciprocal %56 {approx = true} : vector<1x1xf32> -> vector<1x1xf32>
      %c0_23 = arith.constant 0 : index
      %c0_24 = arith.constant 0 : index
      %58 = vector.load %arg8[%c0_23, %c0_24] : memref<1x32xf32, #tpu.memory_space<vmem>>, vector<1x32xf32>
      %59 = vector.broadcast %57 : vector<1x1xf32> to vector<1x32xf32>
      %60 = arith.mulf %58, %59 : vector<1x32xf32>
      %cst_25 = arith.constant 1.000000e+00 : f32
      %61 = vector.broadcast %cst_25 : f32 to vector<1x1xf32>
      %62 = arith.minimumf %54, %61 : vector<1x1xf32>
      %c0_26 = arith.constant 0 : index
      %c0_27 = arith.constant 0 : index
      %63 = vector.load %arg5[%c0_26, %c0_27] : memref<32x128xf32, #tpu.memory_space<vmem>>, vector<32x128xf32>
      %cst_28 = arith.constant dense<0.000000e+00> : vector<1x128xf32>
      %64 = tpu.matmul %60, %63, %cst_28 {dimension_numbers = #tpu.dot_dimension_numbers<[1], [0], [0], [1], [0, 0, 1, 1], [], []>} : vector<1x32xf32>, vector<32x128xf32>, vector<1x128xf32> -> vector<1x128xf32>
      %c0_29 = arith.constant 0 : index
      %c0_30 = arith.constant 0 : index
      %65 = vector.load %arg6[%c0_29, %c0_30] : memref<1x128xf32, #tpu.memory_space<vmem>>, vector<1x128xf32>
      %66 = vector.broadcast %62 : vector<1x1xf32> to vector<1x128xf32>
      %67 = arith.mulf %65, %66 : vector<1x128xf32>
      %68 = arith.addf %64, %67 : vector<1x128xf32>
      %c0_31 = arith.constant 0 : index
      %c0_32 = arith.constant 0 : index
      %c0_33 = arith.constant 0 : index
      %69 = vector.load %arg7[%c0_31, %c0_32, %c0_33] : memref<1x1x128xf32, #tpu.memory_space<vmem>>, vector<1x1x128xf32>
      %70 = vector.shape_cast %69 : vector<1x1x128xf32> to vector<1x128xf32>
      %71 = vector.shape_cast %68 : vector<1x128xf32> to vector<1x1x128xf32>
      tpu.vector_store %arg7[%c0_31, %c0_32, %c0_33], %71 {strides = array<i32>} : memref<1x1x128xf32, #tpu.memory_space<vmem>>, vector<1x1x128xf32>,
    } else {
    }
    return
  }
  func.func @transform_0(%arg0: i32, %arg1: i32) -> (i32, i32, i32) {
    %c0_i32 = arith.constant 0 : i32
    %c0_i32_0 = arith.constant 0 : i32
    return %arg0, %arg1, %c0_i32 : i32, i32, i32
  }
  func.func @transform_1(%arg0: i32, %arg1: i32) -> (i32, i32) {
    %c0_i32 = arith.constant 0 : i32
    %c0_i32_0 = arith.constant 0 : i32
    %c0_i32_1 = arith.constant 0 : i32
    return %c0_i32, %c0_i32_0 : i32, i32
  }
  func.func @transform_2(%arg0: i32, %arg1: i32) -> (i32, i32) {
    %c0_i32 = arith.constant 0 : i32
    %c0_i32_0 = arith.constant 0 : i32
    %c0_i32_1 = arith.constant 0 : i32
    return %c0_i32, %c0_i32_0 : i32, i32
  }
  func.func @transform_3(%arg0: i32, %arg1: i32) -> (i32, i32) {
    %c0_i32 = arith.constant 0 : i32
    %c0_i32_0 = arith.constant 0 : i32
    %c0_i32_1 = arith.constant 0 : i32
    return %c0_i32, %c0_i32_0 : i32, i32
  }
  func.func @transform_4(%arg0: i32, %arg1: i32) -> (i32, i32) {
    %c0_i32 = arith.constant 0 : i32
    %c0_i32_0 = arith.constant 0 : i32
    %c0_i32_1 = arith.constant 0 : i32
    return %c0_i32, %c0_i32_0 : i32, i32
  }
  func.func @transform_5(%arg0: i32, %arg1: i32) -> (i32, i32, i32) {
    %c0_i32 = arith.constant 0 : i32
    %c0_i32_0 = arith.constant 0 : i32
    %c0_i32_1 = arith.constant 0 : i32
    return %arg0, %c0_i32, %c0_i32_0 : i32, i32, i32
  }
}

</mosaic_0001>

<bundles_post_ra>
// kernel: tpu_custom_call.1
= control target key start
LH: loop header
LB: loop body
LE: loop exit
PB: predicated region body
PF: predicated region fallthrough
CT: control target
= control target key end

     0   :  { %10 = vsyncpa [#allocation5], 0  ;;  %s881_s0 = inlined_call_operand.vmem [shape: f32[4,8,4], index: 0, kind: input, shape index: {}]   ;;  %s882_s1 = inlined_call_operand.vmem [shape: f32[4,32], index: 1, kind: input, shape index: {}]   ;;  %s883_s2 = inlined_call_operand.vmem [shape: f32[1,32], index: 2, kind: input, shape index: {}]   ;;  %s884_s3 = inlined_call_operand.vmem [shape: f32[32,128], index: 3, kind: input, shape index: {}]   ;;  %s885_s4 = inlined_call_operand.vmem [shape: f32[1,128], index: 4, kind: input, shape index: {}]   ;;  %s886_s5 = inlined_call_operand.hbm [shape: f32[4,1,128], index: 5, kind: output, shape index: {}]  }
   0x1   :  { %12 = vsyncpa [#allocation5 + $0x1], 0  ;;  %s742_s18 = smov 0   ;;  %s744_s19 = smov 0  }
   0x2   :  { %s746_s20 = smov 0   ;;  %s748_s21 = smov 0  }
   0x3   :  { %s750_s22 = smov 0   ;;  %s752_s23 = smov 0  }
   0x4 LB: > { %s520_s24 = sadd.s32 4294967295, %s702_s23   ;;  %s521_s25 = sadd.s32 4294967294, %s702_s23   ;;  %s702_s23 = sphi %s752_s23, %s18_s23   ;;  %s698_s22 = sphi %s750_s22, %s893_s22   ;;  %s694_s21 = sphi %s748_s21, %s892_s21   ;;  %s690_s20 = sphi %s746_s20, %s891_s20   ;;  %s686_s19 = sphi %s744_s19, %s890_s19   ;;  %s682_s18 = sphi %s742_s18, %s889_s18  }
   0x5   : > { %s30_s26 = sadd.s32 1, %s698_s22  ;;  %s149_s27 = sadd.s32 1, %s690_s20 }
   0x6   : > { %p32_p0 = scmp.ge.s32.totalorder %s30_s26, 4  ;;  %p159_p1 = scmp.ne.s32.totalorder %s690_s20, %s686_s19 }
   0x7   : > { %p160_p2 = scmp.eq.s32.totalorder %s520_s24, 3  ;;  %p165_p3 = scmp.ne.s32.totalorder %s686_s19, %s682_s18 }
   0x8   : > { %s895_s26 = smov (%p32_p0, %s30_s26), 0  ;;  %p166_p5 = scmp.eq.s32.totalorder %s521_s25, 3 }
   0x9   : > { %p782_p4 = por %p160_p2, %p159_p1  ;;  %s146_s29 = ssub.s32 %s698_s22, %s895_s26 }
   0xa   : > { %p524_p6 = scmp.ge.s32.totalorder %s702_s23, 1  ;;  %p147_p7 = scmp.eq.s32.totalorder %s146_s29, 0 }
   0xb   : > { %p789_p8 = por %p166_p5, %p165_p3  ;;  %p206_p9 = scmp.lt.s32.totalorder %s702_s23, 5 }
   0xc   : > { %s795_s6 = scalar_select %p147_p7, %s690_s20, %s149_s27  }
   0xd   : > { %p207_p10 = pnand %p524_p6, %p206_p9 }
   0xe   : > { %p235_p11 = scmp.lt.s32.totalorder (!%p207_p10), %s694_s21, 3  ;;  %v704_v0 = vmov (!%p207_p10), 0   ;;  %v705_v1 = vmov (!%p207_p10), 2   ;;  %vm246_vm0 = vcmask (!%p207_p10), 253952   ;;  %vm248_vm1 = vcmask (!%p207_p10), 0   ;;  %v352_v19 = vld [vmem:[%s884_s3] sm:$0xff] (!%p207_p10) }
   0xf   : > { %210 = sbr.rel (%p207_p10) target bundleno = 425 (0x1a9), region = 40  ;;  %616 = vset.pattern.permute.xlu0 (!%p207_p10), %v704_v0  ;;  %618 = vset.pattern.permute.xlu1 (!%p207_p10), %v705_v1  ;;  %v706_v2 = vmov (!%p207_p10), 0.0   ;;  %vm323_vm2 = vcmask (!%p207_p10), 7168   ;;  %v707_v7 = vmov (!%p207_p10), 1   ;;  %v708_v8 = vmov (!%p207_p10), 3   ;;  %v353_v20 = vld [vmem:[%s884_s3 + $0x8] sm:$0xff] (!%p207_p10) }
  0x10   : > { %247 = vst.msk [vmem:[#allocation2] sm:$0x1] (!%p207_p10), %vm246_vm0, %v706_v2  ;;  %v709_v21 = vmov (!%p207_p10), 0.0|0.0   ;;  %v549_v22 = vpack.c.bf16 (!%p207_p10), %v353_v20, %v352_v19  ;;  %v354_v23 = vld [vmem:[%s884_s3 + $0x10] sm:$0xff] (!%p207_p10)  ;;  %v355_v24 = vld [vmem:[%s884_s3 + $0x18] sm:$0xff] (!%p207_p10)  ;;  %vm710_vm4 = vmmov (!%p207_p10), 0   ;;  %v261_v27 = vlaneseq (!%p207_p10) }
  0x11   : > { %249 = vst.msk [vmem:[#allocation3] sm:$0x1] (!%p207_p10), %vm248_vm1, %v706_v2  ;;  %548 = vmatprep.subr.bf16.mxu0 (!%p207_p10), %v709_v21  ;;  %v552_v26 = vpack.c.bf16 (!%p207_p10), %v355_v24, %v354_v23  ;;  %545 = vmatprep.mubr.msk.f32.mxu0 (!%p207_p10), %vm710_vm4, %v706_v2  ;;  %v254_v30 = vld [vmem:[%s882_s1] sm:$0xf] (!%p207_p10)  ;;  %vm311_vm5 = vcmask (!%p207_p10), 261120   ;;  %s233_s9 = sand.u32 (!%p207_p10), 1, %s686_s19  }
  0x12   : > { %550 = vmatpush3.bf16.msra.mxu0 (!%p207_p10), %v549_v22  ;;  %v262_v28 = vshrl.u32 (!%p207_p10), %v261_v27, 7  ;;  %v527_v39 = vld [vmem:[%s883_s2] ss:$0 sm:$0xff] (!%p207_p10)  ;;  %s529_s12 = sshll.u32 (!%p207_p10), %s694_s21, 4  ;;  %s234_s13 = scalar_lea.vmem (!%p207_p10), [#allocation4], %s233_s9 }
  0x13   : > { %551 = vmatprep.subr.bf16.mxu0 (!%p207_p10), %v709_v21  ;;  %s454_s14 = sshll.u32 (!%p207_p10), %s234_s13, 4  ;;  %s834_s17 = scalar_lea.hbm (!%p207_p10), %s886_s5, %s529_s12  ;;  %s836_s14 = int_to_ptr.vmem [resolvable:$true] %s454_s14 }
  0x14   : > { %v263_v29 = vsub.s32 (!%p207_p10), 0, %v262_v28  ;;  %v279_v32 = vsub.s32 (!%p207_p10), 1, %v262_v28  ;;  %v289_v34 = vsub.s32 (!%p207_p10), 2, %v262_v28  ;;  %v299_v36 = vsub.s32 (!%p207_p10), 3, %v262_v28  ;;  %s442_s24 = scalar_lea.sflag (!%p207_p10), [#allocation5], %s233_s9  ;;  %s624_s25 = scalar_lea.vmem (!%p207_p10), %s836_s14, 16 }
  0x15   : > { %p625_p12 = scmp.ne.s32.totalorder (!%p207_p10), %s836_s14, %s624_s25 }
  0x16   : > { %s236_s7 = scalar_select %p235_p11, %s694_s21, 3  ;;  %553 = vmatpush3.bf16.msra.mxu0 %v552_v26  ;;  %v264_v31 = vrot.slane %v254_v30, %v263_v29  ;;  %v280_v38 = vrot.slane %v254_v30, %v279_v32  ;;  %v290_v40 = vrot.slane %v254_v30, %v289_v34  ;;  %v300_v41 = vrot.slane %v254_v30, %v299_v36 }
  0x17   : > { %v304_v60 = vld [vmem:[#allocation2] sm:$0x1]  ;;  %p626_p13 = pnand %p625_p12, %p782_p4  ;;  %s711_s21 = smov [#allocation4]  }
  0x18   : > { %s525_s8 = sshll.u32 %s236_s7, 3  ;;  %v322_v13 = vld [vmem:[#allocation3] sm:$0x1]  ;;  %s628_s27 = sshll.u32 %s711_s21, 4  ;;  %s629_s27 = int_to_ptr.vmem [resolvable:$false] %s628_s27 }
  0x19   : > { %s241_s11 = scalar_lea.vmem %s881_s0, %s525_s8  ;;  %p627_p0 = pneg %p626_p13 }
  0x1a   : > { %v250_v3 = vld [vmem:[%s241_s11] sm:$0xff]  ;;  %s630_s29 = scalar_lea.vmem %s629_s27, 32  ;;  %p631_p1 = scmp.lt.s32.totalorder %s836_s14, %s629_s27 }
  0x1b   : > { %258 = vperm.xlu0 %616, %v250_v3   ;;  %284 = vperm.xlu1 %618, %v250_v3   ;;  %vm251_vm3 = vcmp.ne.f32.partialorder %v250_v3, 0.0  ;;  %p632_p2 = scmp.lt.s32.totalorder %s630_s29, %s624_s25 }
  0x1c   : > { %v526_v4 = vsel %vm251_vm3, 1.0, %v706_v2 }
  0x1d   : > { %v324_v5 = vsel %vm323_vm2, %v526_v4, 0.0  ;;  %p633_p3 = por %p632_p2, %p631_p1 }
  0x1e   : > { %v325_v6 = vrot.slane %v324_v5, 4 }
  0x1f   : > { %617 = vset.pattern.permute.xlu0 %v707_v7  ;;  %619 = vset.pattern.permute.xlu1 %v708_v8  ;;  %p634_p5 = pnand %p633_p3, %p627_p0 }
  0x20   : > { %274 = vperm.xlu0 %617, %v250_v3   ;;  %294 = vperm.xlu1 %619, %v250_v3   ;;  %v326_v9 = vadd.f32 %v325_v6, %v324_v5  ;;  %v356_v5 = vld [vmem:[%s885_s4] sm:$0x1] }
  0x22   : > { %v327_v10 = vrot.slane %v326_v9, 2 }
  0x24   : > { %620 = vset.pattern.permute.xlu1 %v704_v0  ;;  %v328_v11 = vadd.f32 %v327_v10, %v326_v9  ;;  %621 = vset.pattern.permute.xlu0 %v704_v0 }
  0x25   : > { %307 = vperm.xlu1 %620, %v526_v4  }
  0x26   : > { %v329_v12 = vrot.slane %v328_v11, 1 }
  0x28   : > { %v330_v14 = vadd.f32 %v329_v12, %v328_v11 }
  0x2a   : > { %v331_v15 = vadd.f32 %v330_v14, %v322_v13 }
  0x2c   : > { %333 = vst.msk [vmem:[#allocation3] sm:$0x1] %vm248_vm1, %v331_v15 }
  0x33   : > { %v337_v16 = vld [vmem:[#allocation3] sm:$0x1] }
  0x34   : > { %v351_v17 = vmin.f32 %v337_v16, 1.0  ;;  %v338_v18 = vmax.f32 %v337_v16, 1.0 }
  0x36   : > { %359 = vperm.xlu1 %620, %v351_v17   ;;  %622 = vrcp.f32 %v338_v18 }
  0x40   : > { %v623_v25 = vpop.eup %622 }
  0x41   : > { %343 = vperm.xlu0 %621, %v623_v25  }
  0x9a   : > { %v259_v33 = vpop.permute.xlu0 %258  ;;  %v285_v35 = vpop.permute.xlu1 %284 }
  0x9b   : > { %v265_v37 = vmul.f32 %v264_v31, %v259_v33  ;;  %v291_v46 = vmul.f32 %v290_v40, %v285_v35 }
  0x9d   : > { %v272_v44 = vadd.f32 %v527_v39, %v265_v37 }
  0x9f   : > { %v275_v42 = vpop.permute.xlu0 %274  ;;  %v295_v43 = vpop.permute.xlu1 %294 }
  0xa0   : > { %v281_v45 = vmul.f32 %v280_v38, %v275_v42  ;;  %v301_v48 = vmul.f32 %v300_v41, %v295_v43 }
  0xa2   : > { %v282_v47 = vadd.f32 %v281_v45, %v272_v44 }
  0xa4   : > { %v292_v49 = vadd.f32 %v291_v46, %v282_v47  ;;  %v308_v51 = vpop.permute.xlu1 %307 }
  0xa6   : > { %v302_v50 = vadd.f32 %v301_v48, %v292_v49 }
  0xa8   : > { %v303_v52 = vmax.f32 %v302_v50, 0.0 }
  0xaa   : > { %v310_v53 = vmul.f32 %v308_v51, %v303_v52 }
  0xac   : > { %v312_v54 = vsel %vm311_vm5, %v310_v53, 0.0 }
  0xad   : > { %v313_v55 = vrot.slane %v312_v54, 4 }
  0xaf   : > { %v314_v56 = vadd.f32 %v313_v55, %v312_v54 }
  0xb1   : > { %v315_v57 = vrot.slane %v314_v56, 2 }
  0xb3   : > { %v316_v58 = vadd.f32 %v315_v57, %v314_v56 }
  0xb5   : > { %v317_v59 = vrot.slane %v316_v58, 1  ;;  %v360_v3 = vpop.permute.xlu1 %359 }
  0xb6   : > { %v365_v4 = vrot.slane %v360_v3, %v263_v29 }
  0xb7   : > { %v318_v61 = vadd.f32 %v317_v59, %v316_v58 }
  0xb8   : > { %v366_v6 = vmul.f32 %v365_v4, %v356_v5 }
  0xb9   : > { %v319_v62 = vadd.f32 %v318_v61, %v304_v60 }
  0xbb   : > { %321 = vst.msk [vmem:[#allocation2] sm:$0x1] %vm246_vm0, %v319_v62 }
  0xc0   : > { %v344_v63 = vpop.permute.xlu0 %343 }
  0xc1   : > { %v349_v0 = vrot.slane %v344_v63, %v263_v29 }
  0xc2   : > { %v340_v1 = vld [vmem:[#allocation2] sm:$0x1] }
  0xc3   : > { %v350_v2 = vmul.f32 %v349_v0, %v340_v1 }
  0xc5   : > { %546 = vmatmul.mubr.msk.f32.vlgmr.msra.gmra.mrb[0].mxu0 %vm311_vm5, %v350_v2 }
 0x198   : > { %v436_v7 = vpop.f32.mrb[0].mxu0 }
 0x199   : > { %v437_v8 = vadd.f32 %v436_v7, %v366_v6  ;;  %v547_v9 = vpop.f32.mrb[1].mxu0 }
 0x19b   : > { %440 = vst [vmem:[%s234_s13] sm:$0x1] %v437_v8 }
 0x19c   : > { %637 = shalt.err (!%p634_p5)
}
 0x19d   : > { %s638_s7 = scalar_lea.hbm %s834_s17, 16  ;;  %s642_s10 = scalar_lea.hbm %s886_s5, 64 }
 0x19e   : > { %p639_p6 = scmp.ne.s32.totalorder %s834_s17, %s638_s7  ;;  %p643_p10 = scmp.lt.u32.totalorder %s834_s17, %s886_s5 }
 0x19f   : > { %p644_p11 = scmp.lt.u32.totalorder %s642_s10, %s638_s7  ;;  %p646_p13 = scmp.lt.u32.totalorder %s638_s7, %s834_s17 }
 0x1a0   : > { %p640_p7 = pnand %p639_p6, %p782_p4 }
 0x1a1   : > { %p645_p12 = por %p644_p11, %p643_p10 }
 0x1a2   : > { %p641_p9 = pneg %p640_p7 }
 0x1a3   : > { %p647_p0 = por %p646_p13, %p645_p12 }
 0x1a5   : > { %p648_p1 = pnand %p647_p0, %p641_p9 }
 0x1a7   : > { %651 = shalt.err (!%p648_p1)
}
 0x1a8   : > { %554 = dma.vmem_to_hbm [thread:$0]  (%p782_p4), %s836_s14, 16, %s834_s17, %s442_s24  }
 0x1a9 PF: > { %p560_p2 = scmp.ge.s32.totalorder %s702_s23, 2  ;;  %s466_s13 = sand.u32 1, %s682_s18  }
 0x1aa   : > { %s467_s15 = scalar_lea.sflag [#allocation5], %s466_s13 }
 0x1ab   : > { %p557_p3 = pnand %p560_p2, %p789_p8 }
 0x1ad   : > { %677 = dma.done.wait (!%p557_p3), %s467_s15, 16  }
 0x1ae   : > { %679 = vsyncadd (!%p557_p3), %s467_s15, 4294967280  ;;  %s18_s23 = sadd.s32 1, %s702_s23   ;;  %s889_s18 = smov %s686_s19 }
 0x1af   : > { %p15_p5 = scmp.ge.s32.totalorder %s18_s23, 6   ;;  %s890_s19 = smov %s690_s20 }
 0x1b0   : > { %s891_s20 = smov %s795_s6  ;;  %s892_s21 = smov %s698_s22 }
 0x1b1   : > { %s893_s22 = smov %s895_s26  ;;  %17 = sbr.rel (!%p15_p5) target bundleno = 4 (0x4), region = 83 }
 0x1b8   :  { %471 = vsyncpa [#allocation5], 1 }
 0x1b9   :  { %473 = vsyncpa [#allocation5 + $0x1], 1 }

</bundles_post_ra>
